<compile_context>
chip_gen: v6e
topology: v6e:2x2x1
jax: 0.10.0
libtpu: 0.0.40
codegen_flags: <defaults>
</compile_context>

<pallas_src>
import jax
import jax.numpy as jnp
from jax.experimental import pallas as pl
from jax.experimental.pallas import tpu as pltpu


def _relu2_kernel(x_ref, o_ref):
    # Non-float inputs are upcast in-register here (no extra HBM pass);
    # float inputs compute in their own dtype (matches torch semantics).
    x = x_ref[...].astype(o_ref.dtype)
    r = jnp.maximum(x, jnp.zeros_like(x))
    o_ref[...] = (r * r) * jnp.asarray(0.5, dtype=r.dtype)


_LANE_CHOICES = (1024, 512, 256, 128)
_MIN_TILE_BYTES = 512 * 1024          # smallest tile we accept when splitting for megacore
_budget_cache = {}


def _round_up(a: int, m: int) -> int:
    return ((a + m - 1) // m) * m


def _tile_and_vmem_budget():
    """Generation-aware (target_tile_bytes, vmem_limit_bytes)."""
    if "v" in _budget_cache:
        return _budget_cache["v"]
    tile, limit = 4 * 1024 * 1024, 48 * 1024 * 1024          # safe fallback
    try:
        info = pltpu.get_tpu_info()
        vmem = int(getattr(info, "vmem_capacity_bytes"))
        if vmem <= 64 * 1024 * 1024:
            # v7x-class: 64 MiB physical VMEM, ~3.2 TB/s HBM -> bigger tiles,
            # explicit scoped-VMEM limit (default 32 MiB would be exceeded).
            tile, limit = 8 * 1024 * 1024, 48 * 1024 * 1024   # ~32 MiB footprint
        else:
            # v5e/v6e-class: 128 MiB physical VMEM -> 4 MiB tiles (~16 MiB footprint).
            tile, limit = 4 * 1024 * 1024, 64 * 1024 * 1024
    except Exception:
        pass
    _budget_cache["v"] = (tile, limit)
    return tile, limit


def relu2(x: jax.Array) -> jax.Array:
    """Computes 0.5 * relu(x)**2 with a single-pass Pallas TPU kernel."""
    orig_shape = x.shape
    # torch's .mul(0.5) promotes integer/bool tensors to float32; keep that,
    # but do the cast inside the kernel (out dtype f32) instead of a wrapper pass.
    out_dtype = x.dtype if jnp.issubdtype(x.dtype, jnp.floating) else jnp.float32
    if x.size == 0:
        return jnp.zeros(orig_shape, out_dtype)

    n = x.size
    in_item = x.dtype.itemsize
    out_item = jnp.dtype(out_dtype).itemsize
    big_item = max(in_item, out_item)                 # budget VMEM on the larger side
    sub = max(8, 32 // in_item)                       # packed sublane count for input dtype
    tile_bytes, vmem_limit = _tile_and_vmem_budget()
    cparams = pltpu.CompilerParams(
        dimension_semantics=("parallel",),
        vmem_limit_bytes=vmem_limit,
    )

    # ---- Fast path: numel divisible by a lane width -> lane-dense 2D slab,
    # zero-copy reshape, long contiguous DMA rows. --------------------------
    lanes = next((w for w in _LANE_CHOICES if n % w == 0), None)
    if lanes is not None:
        rows = n // lanes
        x2d = x.reshape(rows, lanes)
        row_bytes = lanes * big_item
        block_rows = max(sub, (tile_bytes // row_bytes) // sub * sub)
        # Keep at least ~4 parallel grid steps (v7x has 2 TCs sharded over the
        # parallel axis) as long as tiles stay >= ~512 KiB.
        rows_for_4 = _round_up(pl.cdiv(rows, 4), sub)
        min_rows = max(sub, _round_up(pl.cdiv(_MIN_TILE_BYTES, row_bytes), sub))
        block_rows = min(block_rows, max(rows_for_4, min_rows))
        if block_rows >= rows:
            block_rows = rows                          # single full-extent block
        grid = (pl.cdiv(rows, block_rows),)            # ragged last block is masked

        out = pl.pallas_call(
            _relu2_kernel,
            out_shape=jax.ShapeDtypeStruct((rows, lanes), out_dtype),
            grid_spec=pltpu.PrefetchScalarGridSpec(
                num_scalar_prefetch=0,
                grid=grid,
                in_specs=[pl.BlockSpec((block_rows, lanes), lambda i: (i, 0))],
                out_specs=pl.BlockSpec((block_rows, lanes), lambda i: (i, 0)),
            ),
            compiler_params=cparams,
        )(x2d)
        return out.reshape(orig_shape)

    # ---- Ragged path: numel not divisible by 128.  Flat 1-D blocked slab:
    # zero-copy reshape in, exact-size output out, Pallas masks the ragged
    # final block.  No jnp.pad, no trailing slice -> minimum HBM traffic. ----
    x1d = x.reshape(n)
    elem_tile = sub * 128                               # full packed (sublane, lane) tile
    block_elems = max(elem_tile, (tile_bytes // big_item) // elem_tile * elem_tile)
    elems_for_4 = _round_up(pl.cdiv(n, 4), elem_tile)
    min_elems = max(elem_tile, _round_up(pl.cdiv(_MIN_TILE_BYTES, big_item), elem_tile))
    block_elems = min(block_elems, max(elems_for_4, min_elems))
    if block_elems >= n:
        block_elems = n                                 # full-extent block (any size legal)
    grid = (pl.cdiv(n, block_elems),)

    out = pl.pallas_call(
        _relu2_kernel,
        out_shape=jax.ShapeDtypeStruct((n,), out_dtype),
        grid_spec=pltpu.PrefetchScalarGridSpec(
            num_scalar_prefetch=0,
            grid=grid,
            in_specs=[pl.BlockSpec((block_elems,), lambda i: (i,))],
            out_specs=pl.BlockSpec((block_elems,), lambda i: (i,)),
        ),
        compiler_params=cparams,
    )(x1d)
    return out.reshape(orig_shape)


if __name__ == "__main__":
    key = jax.random.PRNGKey(0)

    # Small NCHW-like activation tensor (lane-aligned fast path).
    x = jax.random.normal(key, (2, 4, 16, 16), dtype=jnp.float32)
    y = relu2(x)
    jax.block_until_ready(y)
    y_ref = 0.5 * jnp.square(jnp.maximum(x, 0.0))
    assert y.shape == x.shape and y.dtype == x.dtype
    assert jnp.allclose(y, y_ref, atol=0.0, rtol=0.0), "mismatch (aligned path)"

    # Ragged (non-128-multiple) shape -> single-pass 1D path, no pad / slice.
    x2 = jax.random.normal(jax.random.PRNGKey(1), (3, 5, 7), dtype=jnp.float32)
    y2 = relu2(x2)
    jax.block_until_ready(y2)
    y2_ref = 0.5 * jnp.square(jnp.maximum(x2, 0.0))
    assert y2.shape == x2.shape and y2.dtype == x2.dtype
    assert jnp.allclose(y2, y2_ref, atol=0.0, rtol=0.0), "mismatch (ragged path)"

    # Integer input: upcast to f32 happens inside the kernel (no extra HBM pass).
    x3 = jax.random.randint(jax.random.PRNGKey(2), (4, 64), 0, 7, dtype=jnp.int32)
    y3 = relu2(x3)
    jax.block_until_ready(y3)
    y3_ref = 0.5 * jnp.square(jnp.maximum(x3.astype(jnp.float32), 0.0))
    assert y3.shape == x3.shape and y3.dtype == jnp.float32
    assert jnp.allclose(y3, y3_ref, atol=0.0, rtol=0.0), "mismatch (int upcast path)"

    # TODO(synk): inplace=True has no JAX equivalent (immutable arrays); would
    # need buffer donation + input_output_aliases to mirror it.
    print("KERNEL_OK")
</pallas_src>

<mosaic_0001>
module attributes {stable_mosaic.version = 11 : i64} {
  func.func @_relu2_kernel(%arg0: i32, %arg1: memref<2x1024xf32, #tpu.memory_space<vmem>>, %arg2: memref<2x1024xf32, #tpu.memory_space<vmem>>) attributes {dimension_semantics = [#tpu.dimension_semantics<parallel>], iteration_bounds = array<i64: 1>, scalar_prefetch = 0 : i64, scratch_operands = 0 : i64, tpu.core_type = #tpu.core_type<tc>, window_params = [{transform_indices = @transform_0, window_bounds = array<i64: 2, 1024>}, {transform_indices = @transform_1, window_bounds = array<i64: 2, 1024>}]} {
    %c0 = arith.constant 0 : index
    %c0_0 = arith.constant 0 : index
    %0 = vector.load %arg1[%c0, %c0_0] : memref<2x1024xf32, #tpu.memory_space<vmem>>, vector<2x1024xf32>
    %cst = arith.constant 0.000000e+00 : f32
    %1 = vector.broadcast %cst : f32 to vector<2x1024xf32>
    %2 = arith.maximumf %0, %1 : vector<2x1024xf32>
    %3 = arith.mulf %2, %2 : vector<2x1024xf32>
    %cst_1 = arith.constant 5.000000e-01 : f32
    %4 = vector.broadcast %cst_1 : f32 to vector<2x1024xf32>
    %5 = arith.mulf %3, %4 : vector<2x1024xf32>
    %c0_2 = arith.constant 0 : index
    %c0_3 = arith.constant 0 : index
    %6 = vector.load %arg2[%c0_2, %c0_3] : memref<2x1024xf32, #tpu.memory_space<vmem>>, vector<2x1024xf32>
    tpu.vector_store %arg2[%c0_2, %c0_3], %5 {strides = array<i32>} : memref<2x1024xf32, #tpu.memory_space<vmem>>, vector<2x1024xf32>,
    return
  }
  func.func @transform_0(%arg0: i32) -> (i32, i32) {
    %c0_i32 = arith.constant 0 : i32
    %c0_i32_0 = arith.constant 0 : i32
    return %arg0, %c0_i32 : i32, i32
  }
  func.func @transform_1(%arg0: i32) -> (i32, i32) {
    %c0_i32 = arith.constant 0 : i32
    %c0_i32_0 = arith.constant 0 : i32
    return %arg0, %c0_i32 : i32, i32
  }
}

</mosaic_0001>

<bundles_post_ra>
// kernel: tpu_custom_call.1
= control target key start
LH: loop header
LB: loop body
LE: loop exit
PB: predicated region body
PF: predicated region fallthrough
CT: control target
= control target key end

     0   :  { %6 = vsyncpa [#allocation3], 0  ;;  %s110_s0 = inlined_call_operand.hbm [shape: f32[2,1024], index: 0, kind: input, shape index: {}]   ;;  %s111_s1 = inlined_call_operand.hbm [shape: f32[2,1024], index: 1, kind: output, shape index: {}]  }
   0x1   :  { %7 = vsyncpa [#allocation4], 0  ;;  %s92_s6 = smov [#allocation2]  }
   0x2   :  { %s14_s7 = sshll.u32 %s92_s6, 4  ;;  %s15_s7 = int_to_ptr.vmem [resolvable:$true] %s14_s7 }
   0x3   :  { %s56_s8 = scalar_lea.vmem %s15_s7, 256  ;;  %p61_p1 = scmp.lt.s32.totalorder %s15_s7, %s15_s7 }
   0x4   :  { %p57_p0 = scmp.ne.s32.totalorder %s15_s7, %s56_s8  ;;  %p62_p2 = scmp.lt.s32.totalorder %s56_s8, %s56_s8 }
   0x6   :  { %p63_p3 = por %p62_p2, %p61_p1 }
   0x8   :  { %p64_p4 = pnand %p63_p3, %p57_p0 }
   0xa   :  { %67 = shalt.err (!%p64_p4)
}
   0xb   :  { %17 = dma.hbm_to_vmem [thread:$0]  %s110_s0, 256, %s15_s7, [#allocation3]  }
   0xc   :  { %88 = dma.done.wait [#allocation3], 256  }
   0xd   :  { %89 = vsyncadd [#allocation3], 4294967040  ;;  %v21_v0 = vld [vmem:[#allocation2] sm:$0xff]  ;;  %v22_v1 = vld [vmem:[#allocation2 + $0x8] sm:$0xff]  ;;  %s93_s11 = smov [#allocation5]  }
   0xe   :  { %v23_v2 = vmax.f32 %v21_v0, 0.0  ;;  %v24_v3 = vmax.f32 %v22_v1, 0.0  ;;  %s37_s12 = sshll.u32 %s93_s11, 4  ;;  %s38_s12 = int_to_ptr.vmem [resolvable:$true] %s37_s12 }
   0xf   :  { %s68_s13 = scalar_lea.vmem %s38_s12, 256  ;;  %p73_p6 = scmp.lt.s32.totalorder %s38_s12, %s38_s12 }
  0x10   :  { %v25_v4 = vmul.f32 %v23_v2, %v23_v2  ;;  %v26_v5 = vmul.f32 %v24_v3, %v24_v3  ;;  %p69_p5 = scmp.ne.s32.totalorder %s38_s12, %s68_s13  ;;  %p74_p7 = scmp.lt.s32.totalorder %s68_s13, %s68_s13 }
  0x12   :  { %v27_v6 = vmul.f32 0.5, %v25_v4  ;;  %v28_v7 = vmul.f32 0.5, %v26_v5  ;;  %p75_p8 = por %p74_p7, %p73_p6 }
  0x14   :  { %29 = vst [vmem:[#allocation5] sm:$0xff] %v27_v6  ;;  %30 = vst [vmem:[#allocation5 + $0x8] sm:$0xff] %v28_v7  ;;  %p76_p9 = pnand %p75_p8, %p69_p5 }
  0x16   :  { %79 = shalt.err (!%p76_p9)
}
  0x17   :  { %40 = dma.vmem_to_hbm [thread:$0]  %s38_s12, 256, %s111_s1, [#allocation4]  }
  0x18   :  { %90 = dma.done.wait [#allocation4], 256  }
  0x19   :  { %91 = vsyncadd [#allocation4], 4294967040 }
  0x1a   :  { %44 = vsyncpa [#allocation3], 1 }
  0x1b   :  { %45 = vsyncpa [#allocation4], 1 }

</bundles_post_ra>
